<compile_context>
chip_gen: v7x
topology: tpu7x:2x2x1
jax: 0.10.0
libtpu: 0.0.40
codegen_flags: <defaults>
</compile_context>

<pallas_src>
import jax
import jax.numpy as jnp
from jax.experimental import pallas as pl
from jax.experimental.pallas import tpu as pltpu

N_FEATURES = 32        # n_features passed to Net(n_features)
H1, H2, H3 = 38, 16, 1

MAX_TILE = 8192        # upper bound on batch rows (lanes) per grid step
MIN_TILE = 256         # multiple of MXU lane width on v6e/v7x (and of 128 on v5e)
MIN_GRID_STEPS = 4     # keep >= 4 steps so v7x megacore sharding has work


def _round_up(a, m):
    return (a + m - 1) // m * m


def mlp_kernel(x_ref, w1_ref, b1_ref, w2_ref, b2_ref, w3_ref, b3_ref, o_ref):
    # x_ref: (tile, F) f32 in its natural layout.  Transpose (XLU) + bf16 cast
    # happen here so the wrapper never touches x.  Weights are (out, in) bf16,
    # biases (out, 1) f32.  All dots accumulate in f32 on the MXU.
    xT = x_ref[...].T.astype(jnp.bfloat16)                           # (F, tile) bf16

    z1 = jnp.dot(w1_ref[...], xT,
                 preferred_element_type=jnp.float32) + b1_ref[...]   # (H1, tile) f32
    h1 = jnp.tanh(z1)

    z2 = jnp.dot(w2_ref[...], h1.astype(jnp.bfloat16),
                 preferred_element_type=jnp.float32) + b2_ref[...]   # (H2, tile) f32
    h2 = jnp.tanh(z2)

    z3 = jnp.dot(w3_ref[...], h2.astype(jnp.bfloat16),
                 preferred_element_type=jnp.float32) + b3_ref[...]   # (1, tile) f32

    o_ref[...] = jax.nn.sigmoid(z3).astype(o_ref.dtype)              # lane-dense store


def net_forward(x, params, max_tile=MAX_TILE, min_grid_steps=MIN_GRID_STEPS):
    """x: (B, n_features) f32.  Returns (B, 1) f32, matching Net.forward."""
    w1, b1, w2, b2, w3, b3 = params
    B, F = x.shape

    # Tile: as large as possible (amortize ~0.35us/step pipeline overhead) while
    # keeping >= min_grid_steps grid steps for v7x's 2 TensorCores; lane-aligned
    # to a multiple of 256.  VMEM stays at a few MiB even at tile=8192.
    tile = _round_up(pl.cdiv(B, min_grid_steps), MIN_TILE)
    tile = max(MIN_TILE, min(max_tile, tile))
    grid = (pl.cdiv(B, tile),)   # partial last block handled by Pallas

    full = lambda shape: pl.BlockSpec(shape, lambda i: (0,) * len(shape))

    out = pl.pallas_call(
        mlp_kernel,
        out_shape=jax.ShapeDtypeStruct((H3, B), jnp.float32),
        grid_spec=pltpu.PrefetchScalarGridSpec(
            num_scalar_prefetch=0,
            grid=grid,
            in_specs=[
                pl.BlockSpec((tile, F), lambda i: (i, 0)),  # x: natural (B, F) layout
                full((H1, F)), full((H1, 1)),               # fc1 W, b (VMEM-resident)
                full((H2, H1)), full((H2, 1)),              # fc2 W, b
                full((H3, H2)), full((H3, 1)),              # fc3 W, b
            ],
            out_specs=pl.BlockSpec((H3, tile), lambda i: (0, i)),  # (1, tile) lane-dense
        ),
        compiler_params=pltpu.CompilerParams(
            dimension_semantics=("parallel",),  # batch tiles shard across v7x TCs
        ),
    )(x, w1, b1, w2, b2, w3, b3)

    return out.T  # (B, 1)


def init_params(key, n_features):
    """nn.Linear-style init.  Weights stored PyTorch-style as (out, in), bf16;
    biases as (out, 1), f32."""
    ks = jax.random.split(key, 6)

    def linear(kw, kb, fan_in, fan_out):
        bound = fan_in ** -0.5
        w = jax.random.uniform(kw, (fan_out, fan_in), jnp.float32, -bound, bound)
        b = jax.random.uniform(kb, (fan_out, 1), jnp.float32, -bound, bound)
        return w.astype(jnp.bfloat16), b

    w1, b1 = linear(ks[0], ks[1], n_features, H1)
    w2, b2 = linear(ks[2], ks[3], H1, H2)
    w3, b3 = linear(ks[4], ks[5], H2, H3)
    return (w1, b1, w2, b2, w3, b3)


def net_forward_ref(x, params):
    """Pure-JAX reference mirroring the kernel's bf16-input / f32-accumulate math."""
    w1, b1, w2, b2, w3, b3 = params
    xb = x.T.astype(jnp.bfloat16)                                   # (F, B)
    h1 = jnp.tanh(jnp.dot(w1, xb, preferred_element_type=jnp.float32) + b1)
    h2 = jnp.tanh(jnp.dot(w2, h1.astype(jnp.bfloat16),
                          preferred_element_type=jnp.float32) + b2)
    z3 = jnp.dot(w3, h2.astype(jnp.bfloat16),
                 preferred_element_type=jnp.float32) + b3
    return jax.nn.sigmoid(z3).T                                     # (B, 1)


if __name__ == "__main__":
    key = jax.random.PRNGKey(0)
    kx, kp = jax.random.split(key)

    # B not a multiple of the lane tile -> exercises the partial last block AND
    # a multi-step grid (1000 rows, tile=256 -> 4 grid steps, last one partial).
    B = 1000
    x = jax.random.normal(kx, (B, N_FEATURES), jnp.float32)
    params = init_params(kp, N_FEATURES)

    out = net_forward(x, params)
    out = jax.block_until_ready(out)

    ref = net_forward_ref(x, params)
    assert out.shape == (B, 1), f"bad output shape {out.shape}"
    assert jnp.allclose(out, ref, atol=1e-3, rtol=1e-3), "mismatch vs. pure-JAX reference"

    print("KERNEL_OK")
</pallas_src>

<mosaic_0001>
module attributes {stable_mosaic.version = 11 : i64} {
  func.func @mlp_kernel(%arg0: i32, %arg1: memref<256x32xf32, #tpu.memory_space<vmem>>, %arg2: memref<38x32xbf16, #tpu.memory_space<vmem>>, %arg3: memref<38x1xf32, #tpu.memory_space<vmem>>, %arg4: memref<16x38xbf16, #tpu.memory_space<vmem>>, %arg5: memref<16x1xf32, #tpu.memory_space<vmem>>, %arg6: memref<1x16xbf16, #tpu.memory_space<vmem>>, %arg7: memref<1x1xf32, #tpu.memory_space<vmem>>, %arg8: memref<1x256xf32, #tpu.memory_space<vmem>>) attributes {dimension_semantics = [#tpu.dimension_semantics<parallel>], iteration_bounds = array<i64: 4>, scalar_prefetch = 0 : i64, scratch_operands = 0 : i64, tpu.core_type = #tpu.core_type<tc>, window_params = [{transform_indices = @transform_0, window_bounds = array<i64: 256, 32>}, {pipeline_mode = #tpu.pipeline_mode<synchronous>, transform_indices = @transform_1, window_bounds = array<i64: 38, 32>}, {pipeline_mode = #tpu.pipeline_mode<synchronous>, transform_indices = @transform_2, window_bounds = array<i64: 38, 1>}, {pipeline_mode = #tpu.pipeline_mode<synchronous>, transform_indices = @transform_3, window_bounds = array<i64: 16, 38>}, {pipeline_mode = #tpu.pipeline_mode<synchronous>, transform_indices = @transform_4, window_bounds = array<i64: 16, 1>}, {pipeline_mode = #tpu.pipeline_mode<synchronous>, transform_indices = @transform_5, window_bounds = array<i64: 1, 16>}, {pipeline_mode = #tpu.pipeline_mode<synchronous>, transform_indices = @transform_6, window_bounds = array<i64: 1, 1>}, {transform_indices = @transform_7, window_bounds = array<i64: 1, 256>}]} {
    %c0 = arith.constant 0 : index
    %c0_0 = arith.constant 0 : index
    %0 = vector.load %arg1[%c0, %c0_0] : memref<256x32xf32, #tpu.memory_space<vmem>>, vector<256x32xf32>
    %1 = tpu.transpose %0, [1, 0] : vector<256x32xf32> -> vector<32x256xf32>
    %2 = arith.truncf %1 : vector<32x256xf32> to vector<32x256xbf16>
    %c0_1 = arith.constant 0 : index
    %c0_2 = arith.constant 0 : index
    %3 = vector.load %arg2[%c0_1, %c0_2] : memref<38x32xbf16, #tpu.memory_space<vmem>>, vector<38x32xbf16>
    %cst = arith.constant dense<0.000000e+00> : vector<38x256xf32>
    %4 = tpu.matmul %3, %2, %cst {dimension_numbers = #tpu.dot_dimension_numbers<[1], [0], [0], [1], [0, 0, 1, 1], [], []>} : vector<38x32xbf16>, vector<32x256xbf16>, vector<38x256xf32> -> vector<38x256xf32>
    %c0_3 = arith.constant 0 : index
    %c0_4 = arith.constant 0 : index
    %5 = vector.load %arg3[%c0_3, %c0_4] : memref<38x1xf32, #tpu.memory_space<vmem>>, vector<38x1xf32>
    %6 = vector.broadcast %5 : vector<38x1xf32> to vector<38x256xf32>
    %7 = arith.addf %4, %6 : vector<38x256xf32>
    %8 = math.tanh %7 : vector<38x256xf32>
    %c0_5 = arith.constant 0 : index
    %c0_6 = arith.constant 0 : index
    %9 = vector.load %arg4[%c0_5, %c0_6] : memref<16x38xbf16, #tpu.memory_space<vmem>>, vector<16x38xbf16>
    %10 = arith.truncf %8 : vector<38x256xf32> to vector<38x256xbf16>
    %cst_7 = arith.constant dense<0.000000e+00> : vector<16x256xf32>
    %11 = tpu.matmul %9, %10, %cst_7 {dimension_numbers = #tpu.dot_dimension_numbers<[1], [0], [0], [1], [0, 0, 1, 1], [], []>} : vector<16x38xbf16>, vector<38x256xbf16>, vector<16x256xf32> -> vector<16x256xf32>
    %c0_8 = arith.constant 0 : index
    %c0_9 = arith.constant 0 : index
    %12 = vector.load %arg5[%c0_8, %c0_9] : memref<16x1xf32, #tpu.memory_space<vmem>>, vector<16x1xf32>
    %13 = vector.broadcast %12 : vector<16x1xf32> to vector<16x256xf32>
    %14 = arith.addf %11, %13 : vector<16x256xf32>
    %15 = math.tanh %14 : vector<16x256xf32>
    %c0_10 = arith.constant 0 : index
    %c0_11 = arith.constant 0 : index
    %16 = vector.load %arg6[%c0_10, %c0_11] : memref<1x16xbf16, #tpu.memory_space<vmem>>, vector<1x16xbf16>
    %17 = arith.truncf %15 : vector<16x256xf32> to vector<16x256xbf16>
    %cst_12 = arith.constant dense<0.000000e+00> : vector<1x256xf32>
    %18 = tpu.matmul %16, %17, %cst_12 {dimension_numbers = #tpu.dot_dimension_numbers<[1], [0], [0], [1], [0, 0, 1, 1], [], []>} : vector<1x16xbf16>, vector<16x256xbf16>, vector<1x256xf32> -> vector<1x256xf32>
    %c0_13 = arith.constant 0 : index
    %c0_14 = arith.constant 0 : index
    %19 = vector.load %arg7[%c0_13, %c0_14] : memref<1x1xf32, #tpu.memory_space<vmem>>, vector<1x1xf32>
    %20 = vector.broadcast %19 : vector<1x1xf32> to vector<1x256xf32>
    %21 = arith.addf %18, %20 : vector<1x256xf32>
    %22 = arith.negf %21 : vector<1x256xf32>
    %23 = math.exp %22 : vector<1x256xf32>
    %cst_15 = arith.constant 1.000000e+00 : f32
    %24 = vector.broadcast %cst_15 : f32 to vector<1x256xf32>
    %25 = arith.addf %24, %23 : vector<1x256xf32>
    %26 = arith.divf %24, %25 : vector<1x256xf32>
    %c0_16 = arith.constant 0 : index
    %c0_17 = arith.constant 0 : index
    %27 = vector.load %arg8[%c0_16, %c0_17] : memref<1x256xf32, #tpu.memory_space<vmem>>, vector<1x256xf32>
    tpu.vector_store %arg8[%c0_16, %c0_17], %26 {strides = array<i32>} : memref<1x256xf32, #tpu.memory_space<vmem>>, vector<1x256xf32>,
    return
  }
  func.func @transform_0(%arg0: i32) -> (i32, i32) {
    %c0_i32 = arith.constant 0 : i32
    %c0_i32_0 = arith.constant 0 : i32
    return %arg0, %c0_i32 : i32, i32
  }
  func.func @transform_1(%arg0: i32) -> (i32, i32) {
    %c0_i32 = arith.constant 0 : i32
    %c0_i32_0 = arith.constant 0 : i32
    %c0_i32_1 = arith.constant 0 : i32
    return %c0_i32, %c0_i32_0 : i32, i32
  }
  func.func @transform_2(%arg0: i32) -> (i32, i32) {
    %c0_i32 = arith.constant 0 : i32
    %c0_i32_0 = arith.constant 0 : i32
    %c0_i32_1 = arith.constant 0 : i32
    return %c0_i32, %c0_i32_0 : i32, i32
  }
  func.func @transform_3(%arg0: i32) -> (i32, i32) {
    %c0_i32 = arith.constant 0 : i32
    %c0_i32_0 = arith.constant 0 : i32
    %c0_i32_1 = arith.constant 0 : i32
    return %c0_i32, %c0_i32_0 : i32, i32
  }
  func.func @transform_4(%arg0: i32) -> (i32, i32) {
    %c0_i32 = arith.constant 0 : i32
    %c0_i32_0 = arith.constant 0 : i32
    %c0_i32_1 = arith.constant 0 : i32
    return %c0_i32, %c0_i32_0 : i32, i32
  }
  func.func @transform_5(%arg0: i32) -> (i32, i32) {
    %c0_i32 = arith.constant 0 : i32
    %c0_i32_0 = arith.constant 0 : i32
    %c0_i32_1 = arith.constant 0 : i32
    return %c0_i32, %c0_i32_0 : i32, i32
  }
  func.func @transform_6(%arg0: i32) -> (i32, i32) {
    %c0_i32 = arith.constant 0 : i32
    %c0_i32_0 = arith.constant 0 : i32
    %c0_i32_1 = arith.constant 0 : i32
    return %c0_i32, %c0_i32_0 : i32, i32
  }
  func.func @transform_7(%arg0: i32) -> (i32, i32) {
    %c0_i32 = arith.constant 0 : i32
    %c0_i32_0 = arith.constant 0 : i32
    return %c0_i32, %arg0 : i32, i32
  }
}

</mosaic_0001>

<bundles_post_ra>
// kernel: tpu_custom_call.1
= control target key start
LH: loop header
LB: loop body
LE: loop exit
PB: predicated region body
PF: predicated region fallthrough
CT: control target
= control target key end

     0   :  { %s1228_s0 = inlined_call_operand.vmem [shape: f32[1000,32], index: 0, kind: input, shape index: {}]   ;;  %s1229_s1 = inlined_call_operand.vmem [shape: bf16[38,32], index: 1, kind: input, shape index: {}]   ;;  %s1230_s2 = inlined_call_operand.vmem [shape: f32[38,1], index: 2, kind: input, shape index: {}]   ;;  %s1231_s3 = inlined_call_operand.vmem [shape: bf16[16,38], index: 3, kind: input, shape index: {}]   ;;  %s1232_s4 = inlined_call_operand.vmem [shape: f32[16,1], index: 4, kind: input, shape index: {}]   ;;  %s1233_s5 = inlined_call_operand.vmem [shape: bf16[1,16], index: 5, kind: input, shape index: {}]   ;;  %s1234_s6 = inlined_call_operand.<no memory space> [shape: f32[1,1], index: 6, kind: input, shape index: {}]   ;;  %s1235_s7 = inlined_call_operand.hbm [shape: f32[1,1000], index: 7, kind: output, shape index: {}]  }
   0x1   :  { %v12_v0 = vstv %s1234_s6 }
   0x2   :  { %13 = vst [vmem:[#allocation2] sm:$0x1] %v12_v0 }
   0x3   :  { %14 = vsyncpa [#allocation4], 0 }
   0x4   :  { %16 = vsyncpa [#allocation4 + $0x1], 0  ;;  %s1052_s26 = smov 0   ;;  %s1054_s27 = smov 0  }
   0x5   :  { %s1056_s28 = smov 0   ;;  %s1058_s29 = smov 0  }
   0x6 LB: > { %s781_s6 = sadd.s32 4294967295, %s1004_s29   ;;  %s782_s30 = sadd.s32 4294967294, %s1004_s29   ;;  %s1004_s29 = sphi %s1058_s29, %s1241_s29   ;;  %s1000_s28 = sphi %s1056_s28, %s1240_s28   ;;  %s996_s27 = sphi %s1054_s27, %s1239_s27   ;;  %s992_s26 = sphi %s1052_s26, %s1238_s26  }
   0x7   : > { %s1075_s8 = sadd.s32 1, %s1004_s29   ;;  %s181_s9 = sadd.s32 1, %s1000_s28 }
   0x8   : > { %s178_s10 = ssub.s32 %s1004_s29, %s1075_s8  ;;  %p191_p0 = scmp.ne.s32.totalorder %s1000_s28, %s996_s27 }
   0x9   : > { %p179_p1 = scmp.eq.s32.totalorder %s178_s10, 0  ;;  %p192_p2 = scmp.eq.s32.totalorder %s781_s6, 3 }
   0xa   : > { %p197_p3 = scmp.ne.s32.totalorder %s996_s27, %s992_s26  ;;  %p198_p4 = scmp.eq.s32.totalorder %s782_s30, 3 }
   0xb   : > { %s1085_s11 = scalar_select %p179_p1, %s1000_s28, %s181_s9  }
   0xc   : > { %p1087_p5 = por %p192_p2, %p191_p0  ;;  %p1091_p6 = por %p198_p4, %p197_p3 }
   0xd   : > { %p785_p7 = scmp.ge.s32.totalorder %s1004_s29, 1  ;;  %p251_p8 = scmp.lt.s32.totalorder %s1004_s29, 5 }
   0xf   : > { %p252_p9 = pnand %p785_p7, %p251_p8 }
  0x10   : > { %s1097_s14 = sshll.u32 (!%p252_p9), %s781_s6, 5  ;;  %v1006_v21 = vmov (!%p252_p9), 0   ;;  %v408_v37 = vld [vmem:[%s1230_s2] sm:$0xff] (!%p252_p9)  ;;  %v409_v38 = vld [vmem:[%s1230_s2 + $0x8] sm:$0xff] (!%p252_p9)  ;;  %v410_v42 = vld [vmem:[%s1230_s2 + $0x10] sm:$0xff] (!%p252_p9)  ;;  %vm451_vm0 = vcmask (!%p252_p9), 261120  }
  0x11   : > { %255 = sbr.rel (%p252_p9) target bundleno = 924 (0x39c), region = 48  ;;  %p292_p10 = scmp.lt.s32.totalorder (!%p252_p9), %s1097_s14, 124  ;;  %493 = vmatprep.mubr.bf16.mxu0 (!%p252_p9), %v1006_v21  ;;  %900 = vset.pattern.permute.xlu1 (!%p252_p9), %v1006_v21  ;;  %v411_v46 = vld [vmem:[%s1230_s2 + $0x18] sm:$0xff] (!%p252_p9)  ;;  %v412_v50 = vld [vmem:[%s1230_s2 + $0x20] sm:$0x3f] (!%p252_p9)  ;;  %v541_v56 = vld [vmem:[%s1232_s4 + $0x8] sm:$0xff] (!%p252_p9) }
  0x12   : > { %600 = vmatprep.mubr.bf16.mxu1 (!%p252_p9), %v1006_v21  ;;  %415 = vperm.xlu1 (!%p252_p9), %900, %v408_v37   ;;  %v540_v54 = vld [vmem:[%s1232_s4] sm:$0xff] (!%p252_p9)  ;;  %vm561_vm1 = vcmask (!%p252_p9), 1042432   ;;  %vm557_vm2 = vcmask (!%p252_p9), 310272   ;;  %vm628_vm3 = vcmask (!%p252_p9), 130048   ;;  %s284_s10 = sand.u32 (!%p252_p9), 1, %s996_s27   ;;  %s1186_s20 = scalar_lea.hbm (!%p252_p9), %s1235_s7, %s1097_s14 }
  0x13   : > { %v618_v57 = vld [vmem:[#allocation2] sm:$0x1] (!%p252_p9)  ;;  %s709_s21 = scalar_lea.sflag (!%p252_p9), [#allocation4], %s284_s10  ;;  %s1008_s23 = smov (!%p252_p9), [#allocation3]  }
  0x14   : > { %s946_s24 = sshll.u32 (!%p252_p9), %s1008_s23, 4  ;;  %s947_s24 = int_to_ptr.vmem [resolvable:$false] %s946_s24 }
  0x15   : > { %s948_s25 = scalar_lea.vmem (!%p252_p9), %s947_s24, 64 }
  0x16   : > { %420 = vperm.xlu1 (!%p252_p9), %900, %v409_v38  }
  0x18   : > { %s293_s15 = scalar_select %p292_p10, %s1097_s14, 124 }
  0x1a   : > { %s788_s16 = sshll.u32 %s293_s15, 3  ;;  %425 = vperm.xlu1 %900, %v410_v42   ;;  %s786_s15 = sshll.u32 %s284_s10, 1 }
  0x1b   : > { %s1104_s19 = scalar_lea.vmem %s1228_s0, %s788_s16  ;;  %s286_s16 = scalar_lea.vmem [#allocation3], %s786_s15 }
  0x1c   : > { %v303_v1 = vld [vmem:[%s1104_s19] sm:$0xff]  ;;  %v304_v3 = vld [vmem:[%s1104_s19 + $0x8] sm:$0xff]  ;;  %v305_v7 = vld [vmem:[%s1104_s19 + $0x10] sm:$0xff]  ;;  %s723_s17 = sshll.u32 %s286_s16, 4  ;;  %s1188_s17 = int_to_ptr.vmem [resolvable:$true] %s723_s17 }
  0x1d   : > { %v319_v2 = vld [vmem:[%s1104_s19 + $0x80] sm:$0xff]  ;;  %v320_v5 = vld [vmem:[%s1104_s19 + $0x88] sm:$0xff]  ;;  %v321_v8 = vld [vmem:[%s1104_s19 + $0x90] sm:$0xff]  ;;  %s942_s22 = scalar_lea.vmem %s1188_s17, 32  ;;  %p949_p0 = scmp.lt.s32.totalorder %s1188_s17, %s947_s24 }
  0x1e   : > { %v848_v4 = vpack.i.bf16 %v303_v1, %v319_v2  ;;  %v850_v6 = vpack.i.bf16 %v304_v3, %v320_v5  ;;  %v852_v9 = vpack.i.bf16 %v305_v7, %v321_v8  ;;  %v306_v10 = vld [vmem:[%s1104_s19 + $0x18] sm:$0xff]  ;;  %v307_v13 = vld [vmem:[%s1104_s19 + $0x20] sm:$0xff]  ;;  %v308_v16 = vld [vmem:[%s1104_s19 + $0x28] sm:$0xff]  ;;  %430 = vperm.xlu1 %900, %v411_v46   ;;  %p943_p11 = scmp.ne.s32.totalorder %s1188_s17, %s942_s22  ;;  %p950_p1 = scmp.lt.s32.totalorder %s948_s25, %s942_s22 }
  0x1f   : > { %v322_v11 = vld [vmem:[%s1104_s19 + $0x98] sm:$0xff]  ;;  %v323_v14 = vld [vmem:[%s1104_s19 + $0xa0] sm:$0xff]  ;;  %v324_v17 = vld [vmem:[%s1104_s19 + $0xa8] sm:$0xff] }
  0x20   : > { %849 = vxpose.xlu0.b32.start [1/16] (narrow) %v848_v4, 32  ;;  %v854_v12 = vpack.i.bf16 %v306_v10, %v322_v11  ;;  %v856_v15 = vpack.i.bf16 %v307_v13, %v323_v14  ;;  %v858_v18 = vpack.i.bf16 %v308_v16, %v324_v17  ;;  %v309_v19 = vld [vmem:[%s1104_s19 + $0x30] sm:$0xff]  ;;  %v310_v23 = vld [vmem:[%s1104_s19 + $0x38] sm:$0xff]  ;;  %v311_v26 = vld [vmem:[%s1104_s19 + $0x40] sm:$0xff]  ;;  %p944_p12 = pnand %p943_p11, %p1087_p5  ;;  %p951_p2 = por %p950_p1, %p949_p0 }
  0x21   : > { %v325_v20 = vld [vmem:[%s1104_s19 + $0xb0] sm:$0xff]  ;;  %v326_v24 = vld [vmem:[%s1104_s19 + $0xb8] sm:$0xff]  ;;  %v327_v27 = vld [vmem:[%s1104_s19 + $0xc0] sm:$0xff] }
  0x22   : > { %v860_v22 = vpack.i.bf16 %v309_v19, %v325_v20  ;;  %v862_v25 = vpack.i.bf16 %v310_v23, %v326_v24  ;;  %v864_v28 = vpack.i.bf16 %v311_v26, %v327_v27  ;;  %v312_v29 = vld [vmem:[%s1104_s19 + $0x48] sm:$0xff]  ;;  %v313_v32 = vld [vmem:[%s1104_s19 + $0x50] sm:$0xff]  ;;  %v314_v35 = vld [vmem:[%s1104_s19 + $0x58] sm:$0xff]  ;;  %435 = vperm.xlu1 %900, %v412_v50   ;;  %p945_p13 = pneg %p944_p12 }
  0x23   : > { %v328_v30 = vld [vmem:[%s1104_s19 + $0xc8] sm:$0xff]  ;;  %v329_v33 = vld [vmem:[%s1104_s19 + $0xd0] sm:$0xff]  ;;  %v330_v36 = vld [vmem:[%s1104_s19 + $0xd8] sm:$0xff] }
  0x24   : > { %851 = vxpose.xlu0.b32.cont [2/16] (narrow) %v850_v6, 32  ;;  %v866_v31 = vpack.i.bf16 %v312_v29, %v328_v30  ;;  %v868_v34 = vpack.i.bf16 %v313_v32, %v329_v33  ;;  %v870_v39 = vpack.i.bf16 %v314_v35, %v330_v36  ;;  %v315_v40 = vld [vmem:[%s1104_s19 + $0x60] sm:$0xff]  ;;  %v316_v44 = vld [vmem:[%s1104_s19 + $0x68] sm:$0xff]  ;;  %v317_v48 = vld [vmem:[%s1104_s19 + $0x70] sm:$0xff]  ;;  %p952_p3 = pnand %p951_p2, %p945_p13 }
  0x25   : > { %v331_v41 = vld [vmem:[%s1104_s19 + $0xe0] sm:$0xff]  ;;  %v332_v45 = vld [vmem:[%s1104_s19 + $0xe8] sm:$0xff]  ;;  %v333_v49 = vld [vmem:[%s1104_s19 + $0xf0] sm:$0xff] }
  0x26   : > { %v872_v43 = vpack.i.bf16 %v315_v40, %v331_v41  ;;  %v874_v47 = vpack.i.bf16 %v316_v44, %v332_v45  ;;  %v876_v51 = vpack.i.bf16 %v317_v48, %v333_v49  ;;  %v318_v52 = vld [vmem:[%s1104_s19 + $0x78] sm:$0xff]  ;;  %544 = vperm.xlu1 %900, %v540_v54   ;;  %v902_v10 = vld [vmem:[%s1229_s1] sm:$0xff]   ;;  %v903_v11 = vld [vmem:[%s1229_s1 + $0x8] sm:$0xff]  }
  0x27   : > { %v334_v53 = vld [vmem:[%s1104_s19 + $0xf8] sm:$0xff] }
  0x28   : > { %853 = vxpose.xlu0.b32.cont [3/16] (narrow) %v852_v9, 32  ;;  %v878_v55 = vpack.i.bf16 %v318_v52, %v334_v53 }
  0x2a   : > { %549 = vperm.xlu1 %900, %v541_v56  }
  0x2c   : > { %855 = vxpose.xlu0.b32.cont [4/16] (narrow) %v854_v12, 32  ;;  %v904_v12 = vld [vmem:[%s1229_s1 + $0x10] ss:$0 sps:$4 sm:$0x77]  }
  0x2e   : > { %621 = vperm.xlu1 %900, %v618_v57  }
  0x30   : > { %857 = vxpose.xlu0.b32.cont [5/16] (narrow) %v856_v15, 32 }
  0x34   : > { %859 = vxpose.xlu0.b32.cont [6/16] (narrow) %v858_v18, 32 }
  0x38   : > { %861 = vxpose.xlu0.b32.cont [7/16] (narrow) %v860_v22, 32 }
  0x3c   : > { %863 = vxpose.xlu0.b32.cont [8/16] (narrow) %v862_v25, 32 }
  0x40   : > { %865 = vxpose.xlu0.b32.cont [9/16] (narrow) %v864_v28, 32 }
  0x44   : > { %867 = vxpose.xlu0.b32.cont [10/16] (narrow) %v866_v31, 32 }
  0x48   : > { %869 = vxpose.xlu0.b32.cont [11/16] (narrow) %v868_v34, 32 }
  0x4c   : > { %871 = vxpose.xlu0.b32.cont [12/16] (narrow) %v870_v39, 32 }
  0x50   : > { %873 = vxpose.xlu0.b32.cont [13/16] (narrow) %v872_v43, 32 }
  0x54   : > { %875 = vxpose.xlu0.b32.cont [14/16] (narrow) %v874_v47, 32 }
  0x58   : > { %877 = vxpose.xlu0.b32.cont [15/16] (narrow) %v876_v51, 32 }
  0x5c   : > { %879 = vxpose.xlu0.b32.end [16/16] (narrow) %v878_v55, 32 }
  0x85   : > { %901 = vset.pattern.permute.xlu0 %v1006_v21 }
  0x91   : > { %v416_v13 = vpop.permute.xlu1 %415 }
  0x95   : > { %v421_v14 = vpop.permute.xlu1 %420 }
  0x99   : > { %v426_v23 = vpop.permute.xlu1 %425 }
  0x9d   : > { %v431_v28 = vpop.permute.xlu1 %430 }
  0xa0   : > { %v880_v58 = vpop.trf.xlu0 }
  0xa1   : > { %v881_v60 = vunpack.i.l.bf16 %v880_v58  ;;  %v884_v61 = vunpack.i.h.bf16 %v880_v58  ;;  %v436_v38 = vpop.permute.xlu1 %435  ;;  %v905_v58 = vld [vmem:[%s1231_s3] sm:$0xff]  }
  0xa4   : > { %v885_v59 = vpop.trf.xlu0 }
  0xa5   : > { %v886_v62 = vunpack.i.l.bf16 %v885_v59  ;;  %v889_v63 = vunpack.i.h.bf16 %v885_v59  ;;  %v545_v59 = vpop.permute.xlu1 %544 }
  0xa7   : > { %v400_v0 = vpack.c.bf16 %v886_v62, %v881_v60  ;;  %v399_v1 = vpack.c.bf16 %v889_v63, %v884_v61 }
  0xa8   : > { %v890_v2 = vpop.trf.xlu0 }
  0xa9   : > { %461 = vmatprep.subr.bf16.mxu0 %v400_v0  ;;  %v894_v3 = vunpack.i.h.bf16 %v890_v2  ;;  %v891_v4 = vunpack.i.l.bf16 %v890_v2  ;;  %v550_v63 = vpop.permute.xlu1 %549 }
  0xaa   : > { %462 = vmatpush1.bf16.msra.mxu0 %v399_v1 }
  0xac   : > { %v895_v5 = vpop.trf.xlu0 }
  0xad   : > { %v899_v6 = vunpack.i.h.bf16 %v895_v5  ;;  %v896_v7 = vunpack.i.l.bf16 %v895_v5 }
  0xaf   : > { %v402_v8 = vpack.c.bf16 %v896_v7, %v891_v4  ;;  %v401_v9 = vpack.c.bf16 %v899_v6, %v894_v3 }
  0xb1   : > { %463 = vmatprep.subr.bf16.mxu0 %v402_v8 }
  0xb2   : > { %464 = vmatpush1.bf16.msra.mxu0 %v401_v9 }
  0xb5   : > { %792 = vmatmul.mubr.msk.bf16.vlgmr.msra.gmra.mrb[0].mxu0 %vm451_vm0, %v902_v10  ;;  %v615_v10 = vld [vmem:[%s1233_s5] sm:$0x1] }
  0xb6   : > { %503 = vmatprep.mubr.bf16.mxu0 %v1006_v21 }
  0xbd   : > { %793 = vmatmul.mubr.msk.bf16.gmra.mrb[4].mxu0 %vm451_vm0, %v903_v11  ;;  %v624_v11 = vlaneseq }
  0xbe   : > { %513 = vmatprep.mubr.bf16.mxu0 %v1006_v21 }
  0xbf   : > { %vm705_vm4 = vcmp.lt.s32.totalorder %v624_v11, 256 }
  0xc5   : > { %794 = vmatmul.mubr.msk.bf16.gmra.mrb[8].mxu0 %vm451_vm0, %v904_v12  ;;  %v625_v12 = vshrl.u32 %v624_v11, 7 }
 0x188   : > { %v495_v15 = vpop.f32.mrb[0].mxu0 }
 0x189   : > { %v496_v16 = vadd.f32 %v495_v15, %v416_v13  ;;  %v497_v17 = vpop.f32.mrb[1].mxu0 }
 0x18a   : > { %v498_v18 = vadd.f32 %v497_v17, %v416_v13  ;;  %v499_v19 = vpop.f32.mrb[2].mxu0  ;;  %v626_v13 = vsub.s32 0, %v625_v12 }
 0x18b   : > { %906 = vtanh.f32 %v496_v16  ;;  %v500_v20 = vadd.f32 %v499_v19, %v421_v14  ;;  %v501_v22 = vpop.f32.mrb[3].mxu0 }
 0x18c   : > { %908 = vtanh.f32 %v498_v18  ;;  %v502_v24 = vadd.f32 %v501_v22, %v421_v14  ;;  %v622_v14 = vpop.permute.xlu1 %621 }
 0x18d   : > { %910 = vtanh.f32 %v500_v20  ;;  %v627_v15 = vrot.slane %v622_v14, %v626_v13 }
 0x18e   : > { %912 = vtanh.f32 %v502_v24 }
 0x190   : > { %v505_v25 = vpop.f32.mrb[4].mxu0 }
 0x191   : > { %v506_v26 = vadd.f32 %v505_v25, %v426_v23  ;;  %v507_v27 = vpop.f32.mrb[5].mxu0 }
 0x192   : > { %v508_v29 = vadd.f32 %v507_v27, %v426_v23  ;;  %v509_v30 = vpop.f32.mrb[6].mxu0 }
 0x193   : > { %914 = vtanh.f32 %v506_v26  ;;  %v510_v31 = vadd.f32 %v509_v30, %v431_v28  ;;  %v511_v32 = vpop.f32.mrb[7].mxu0 }
 0x194   : > { %916 = vtanh.f32 %v508_v29  ;;  %v512_v33 = vadd.f32 %v511_v32, %v431_v28  ;;  %v1007_v29 = vmov 1966171168  }
 0x195   : > { %v907_v34 = vpop.eup %906  ;;  %918 = vtanh.f32 %v510_v31  ;;  %v689_v30 = vunpack.c.l.s4 %v1007_v29 }
 0x196   : > { %v909_v35 = vpop.eup %908  ;;  %920 = vtanh.f32 %v512_v33 }
 0x197   : > { %v911_v36 = vpop.eup %910  ;;  %v690_v31 = vunpack.c.0.s8 %v689_v30 }
 0x198   : > { %v913_v37 = vpop.eup %912  ;;  %v515_v39 = vpop.f32.mrb[8].mxu0  ;;  %v534_v40 = vpack.c.bf16 %v911_v36, %v907_v34 }
 0x199   : > { %v516_v41 = vadd.f32 %v515_v39, %v436_v38  ;;  %v517_v42 = vpop.f32.mrb[9].mxu0  ;;  %v535_v43 = vpack.c.bf16 %v913_v37, %v909_v35  ;;  %v693_v33 = vsub.s32 %v690_v31, %v625_v12 }
 0x19a   : > { %v518_v44 = vadd.f32 %v517_v42, %v436_v38  ;;  %v519_v45 = vpop.f32.mrb[10].mxu0 }
 0x19b   : > { %922 = vtanh.f32 %v516_v41  ;;  %v520_v46 = vpop.f32.mrb[11].mxu0  ;;  %568 = vmatprep.subr.bf16.mxu1 %v535_v43 }
 0x19c   : > { %924 = vtanh.f32 %v518_v44  ;;  %569 = vmatpush1.bf16.msra.mxu1 %v534_v40 }
 0x19d   : > { %v915_v47 = vpop.eup %914 }
 0x19e   : > { %v917_v48 = vpop.eup %916 }
 0x19f   : > { %v919_v49 = vpop.eup %918 }
 0x1a0   : > { %v921_v50 = vpop.eup %920  ;;  %v536_v51 = vpack.c.bf16 %v919_v49, %v915_v47 }
 0x1a1   : > { %v537_v52 = vpack.c.bf16 %v921_v50, %v917_v48 }
 0x1a3   : > { %570 = vmatprep.subr.bf16.mxu1 %v537_v52 }
 0x1a4   : > { %571 = vmatpush1.bf16.msra.mxu1 %v536_v51 }
 0x1a5   : > { %v923_v53 = vpop.eup %922 }
 0x1a6   : > { %v925_v54 = vpop.eup %924  ;;  %v538_v55 = vpack.c.bf16 %v923_v53, %v923_v53 }
 0x1a7   : > { %v539_v56 = vpack.c.bf16 %v925_v54, %v925_v54 }
 0x1a8   : > { %v563_v57 = vsel %vm561_vm1, %v538_v55, 0 }
 0x1a9   : > { %796 = vmatprep.subr.msk.bf16.mxu1 %vm561_vm1, %v539_v56 }
 0x1aa   : > { %573 = vmatpush1.bf16.msra.mxu1 %v563_v57 }
 0x1ad   : > { %797 = vmatmul.mubr.msk.bf16.vlgmr.msra.gmra.mrb[0].mxu1 %vm557_vm2, %v905_v58 }
 0x1ae   : > { %664 = vmatprep.mubr.bf16.mxu1 %v1006_v21 }
 0x280   : > { %v602_v60 = vpop.f32.mrb[0].mxu1 }
 0x281   : > { %v603_v61 = vadd.f32 %v602_v60, %v545_v59  ;;  %v604_v62 = vpop.f32.mrb[1].mxu1 }
 0x282   : > { %v605_v0 = vadd.f32 %v604_v62, %v545_v59  ;;  %v606_v1 = vpop.f32.mrb[2].mxu1 }
 0x283   : > { %926 = vtanh.f32 %v603_v61  ;;  %v607_v2 = vadd.f32 %v606_v1, %v550_v63  ;;  %v608_v3 = vpop.f32.mrb[3].mxu1 }
 0x284   : > { %928 = vtanh.f32 %v605_v0  ;;  %v609_v4 = vadd.f32 %v608_v3, %v550_v63 }
 0x285   : > { %930 = vtanh.f32 %v607_v2 }
 0x286   : > { %932 = vtanh.f32 %v609_v4 }
 0x28d   : > { %v927_v5 = vpop.eup %926 }
 0x28e   : > { %v929_v6 = vpop.eup %928 }
 0x28f   : > { %v931_v7 = vpop.eup %930 }
 0x290   : > { %v933_v8 = vpop.eup %932  ;;  %v616_v9 = vpack.c.bf16 %v931_v7, %v927_v5 }
 0x291   : > { %v617_v21 = vpack.c.bf16 %v933_v8, %v929_v6 }
 0x293   : > { %632 = vmatprep.subr.bf16.mxu1 %v617_v21 }
 0x294   : > { %633 = vmatpush1.bf16.msra.mxu1 %v616_v9 }
 0x297   : > { %798 = vmatmul.mubr.msk.bf16.vlgmr.msra.gmra.mrb[4].mxu1 %vm628_vm3, %v615_v10 }
 0x36a   : > { %v666_v16 = vpop.f32.mrb[4].mxu1 }
 0x36b   : > { %v667_v17 = vadd.f32 %v666_v16, %v627_v15  ;;  %v668_v18 = vpop.f32.mrb[5].mxu1 }
 0x36c   : > { %v669_v19 = vadd.f32 %v668_v18, %v627_v15  ;;  %v670_v20 = vpop.f32.mrb[6].mxu1 }
 0x36d   : > { %v799_v22 = vmul.f32 -1.442695, %v667_v17  ;;  %v671_v23 = vpop.f32.mrb[7].mxu1 }
 0x36e   : > { %v800_v24 = vmul.f32 -1.442695, %v669_v19 }
 0x36f   : > { %934 = vpow2.f32 %v799_v22 }
 0x370   : > { %936 = vpow2.f32 %v800_v24 }
 0x379   : > { %v935_v25 = vpop.eup %934 }
 0x37a   : > { %v937_v26 = vpop.eup %936  ;;  %v679_v27 = vadd.f32 1.0, %v935_v25 }
 0x37b   : > { %v680_v28 = vadd.f32 1.0, %v937_v26 }
 0x37c   : > { %938 = vrcp.f32 %v679_v27 }
 0x37d   : > { %940 = vrcp.f32 %v680_v28 }
 0x386   : > { %v939_v32 = vpop.eup %938 }
 0x387   : > { %v941_v34 = vpop.eup %940 }
 0x388   : > { %v687_v35 = vcombine.low %v939_v32, %v941_v34 }
 0x38a   : > { %v694_v36 = vrot.slane %v687_v35, %v693_v33 }
 0x38c   : > { %v701_v37 = vrot.slane %v694_v36, %v693_v33 }
 0x38e   : > { %707 = vst.msk [vmem:[%s286_s16] sm:$0x3] %vm705_vm4, %v701_v37 }
 0x38f   : > { %955 = shalt.err (!%p952_p3)
}
 0x390   : > { %s956_s14 = scalar_lea.hbm %s1186_s20, 32  ;;  %s960_s9 = scalar_lea.hbm %s1235_s7, 128 }
 0x391   : > { %p957_p4 = scmp.ne.s32.totalorder %s1186_s20, %s956_s14  ;;  %p961_p9 = scmp.lt.u32.totalorder %s1186_s20, %s1235_s7 }
 0x392   : > { %p962_p10 = scmp.lt.u32.totalorder %s960_s9, %s956_s14  ;;  %p964_p12 = scmp.lt.u32.totalorder %s956_s14, %s1186_s20 }
 0x393   : > { %p958_p7 = pnand %p957_p4, %p1087_p5 }
 0x394   : > { %p963_p11 = por %p962_p10, %p961_p9 }
 0x395   : > { %p959_p8 = pneg %p958_p7 }
 0x396   : > { %p965_p13 = por %p964_p12, %p963_p11 }
 0x398   : > { %p966_p0 = pnand %p965_p13, %p959_p8 }
 0x39a   : > { %969 = shalt.err (!%p966_p0)
}
 0x39b   : > { %807 = dma.vmem_to_hbm [thread:$0]  (%p1087_p5), %s1188_s17, 32, %s1186_s20, %s709_s21  }
 0x39c PF: > { %p813_p1 = scmp.ge.s32.totalorder %s1004_s29, 2  ;;  %s735_s16 = sand.u32 1, %s992_s26  }
 0x39d   : > { %s736_s18 = scalar_lea.sflag [#allocation4], %s735_s16 }
 0x39e   : > { %p810_p2 = pnand %p813_p1, %p1091_p6 }
 0x3a0   : > { %987 = dma.done.wait (!%p810_p2), %s736_s18, 32  }
 0x3a1   : > { %989 = vsyncadd (!%p810_p2), %s736_s18, 4294967264  ;;  %p19_p3 = scmp.ge.s32.totalorder %s1075_s8, 6   ;;  %s1238_s26 = smov %s996_s27 }
 0x3a2   : > { %s1239_s27 = smov %s1000_s28  ;;  %s1240_s28 = smov %s1085_s11 }
 0x3a3   : > { %s1241_s29 = smov %s1075_s8  ;;  %21 = sbr.rel (!%p19_p3) target bundleno = 6 (0x6), region = 83 }
 0x3aa   :  { %741 = vsyncpa [#allocation4], 1 }
 0x3ab   :  { %743 = vsyncpa [#allocation4 + $0x1], 1 }

</bundles_post_ra>
